<compile_context>
chip_gen: v7x
topology: tpu7x:2x2x1
jax: 0.10.0
libtpu: 0.0.40
codegen_flags: <defaults>
</compile_context>

<pallas_src>
import numpy as np
import jax
import jax.numpy as jnp
from jax import lax
from jax.experimental import pallas as pl
from jax.experimental.pallas import tpu as pltpu

# ---- small, module-consistent sizes ----
N_POINTS      = 128            # number of points in the sparse tensor (toy size)
C_IN          = 1              # MinkUNet34C(1, num_labeled) -> 1 input channel
FEAT_DIM      = 96             # MinkUNet34C.final.in_channels
NUM_LABELED   = 16
NUM_UNLABELED = 8
DH            = FEAT_DIM // 2  # EP embedding dim (48)
NUM_COS       = NUM_LABELED + NUM_UNLABELED          # fused cosine heads width (24)
FUSED_W       = NUM_COS + DH                         # fused matmul width (72)
OUT_W         = FEAT_DIM + NUM_COS + NUM_UNLABELED   # 96 + 24 + 8 = 128 (lane dense)
TILE_N_MAX    = 1024           # max points per grid step (sweep 512-2048 for real clouds)
EPS           = 1e-12          # torch F.normalize eps

assert OUT_W == 128, "fused output slab must be 128-lane dense"


def _heads_kernel(x_ref, w_enc_ref, w_fused_ref, m_ref, out_ref):
    # ---------------- encoder (stub) ----------------
    # TODO(synk): full MinkUNet34C sparse UNet not translatable; 1x1 projection stub.
    x_in = x_ref[...].astype(jnp.float32)                     # [TN, C_IN]
    feats = x_in * w_enc_ref[...]                             # [TN,1]*[1,D] -> [TN, D]

    # one fused MXU push: [TN,96] x [96, 24(cos) + 48(EP emb)]
    h = jnp.dot(feats, w_fused_ref[...],
                preferred_element_type=jnp.float32)            # [TN, 72]

    # -------- Prototypes heads (cosine classifiers, lab+unlab fused) --------
    # row-normalization of feats commutes with the matmul: scale the cos logits.
    # rsqrt(max(sumsq, eps^2)) == 1 / max(||x||, eps); one EUP op per row.
    inv = lax.rsqrt(jnp.maximum(jnp.sum(feats * feats, axis=1, keepdims=True),
                                EPS * EPS))                    # [TN, 1]
    logits_cos = h[:, :NUM_COS] * inv                          # [TN, 24]

    # -------- EP head (equiangular classifier) --------
    e = jnp.maximum(h[:, NUM_COS:], 0.0)                       # MinkowskiReLU, [TN, 48]
    inv_e = lax.rsqrt(jnp.maximum(jnp.sum(e * e, axis=1, keepdims=True),
                                  EPS * EPS))
    logits_lin = jnp.dot(e, m_ref[...],
                         preferred_element_type=jnp.float32) * inv_e   # [TN, 8]

    # direct lane-slice stores into the single 128-lane-dense output slab
    out_ref[:, :FEAT_DIM] = feats
    out_ref[:, FEAT_DIM:FEAT_DIM + NUM_COS] = logits_cos
    out_ref[:, FEAT_DIM + NUM_COS:] = logits_lin


def _col_normalize(w):
    return w / jnp.maximum(jnp.linalg.norm(w, axis=0, keepdims=True), EPS)


def _round_up(n, m):
    return ((n + m - 1) // m) * m


@jax.jit
def _heads_call(x, w_enc, w_lab, w_unlab, w_emb, M):
    n = x.shape[0]
    # grid-invariant weight prep hoisted out of the per-tile kernel (once per call):
    # fused weight = [col-normalized lab | col-normalized unlab | EP embedding]
    w_fused = jnp.concatenate(
        [_col_normalize(w_lab), _col_normalize(w_unlab), w_emb], axis=1)   # [96, 72]
    m_n = _col_normalize(M)                                                # [48, 8]

    # tile sizing: big tiles to amortize per-step overhead, but prefer >=2 grid
    # steps (v7x has 2 TensorCores; the point axis is "parallel").
    tile = min(TILE_N_MAX, max(128, _round_up(-(-n // 2), 128)))
    n_pad = _round_up(n, tile)
    if n_pad != n:
        x = jnp.pad(x, ((0, n_pad - n), (0, 0)))

    row = lambda i: (i, 0)
    full = lambda i: (0, 0)
    slab = pl.pallas_call(
        _heads_kernel,
        out_shape=jax.ShapeDtypeStruct((n_pad, OUT_W), jnp.float32),
        grid=(n_pad // tile,),
        in_specs=[
            pl.BlockSpec((tile, C_IN), row),          # per-point input feature
            pl.BlockSpec((C_IN, FEAT_DIM), full),     # encoder stub weight
            pl.BlockSpec((FEAT_DIM, FUSED_W), full),  # fused cosine + EP-embedding weight
            pl.BlockSpec((DH, NUM_UNLABELED), full),  # EP.M (pre-normalized)
        ],
        out_specs=pl.BlockSpec((tile, OUT_W), row),
        compiler_params=pltpu.CompilerParams(dimension_semantics=("parallel",)),
        cost_estimate=pl.CostEstimate(
            flops=int(n_pad) * (2 * FEAT_DIM * FUSED_W + 2 * DH * NUM_UNLABELED + 512),
            transcendentals=2 * int(n_pad),
            bytes_accessed=int(n_pad) * (4 * C_IN + 4 * OUT_W)),
    )(x, w_enc, w_fused, m_n)

    slab = slab[:n]
    feats       = slab[:, :FEAT_DIM]
    logits_lab  = slab[:, FEAT_DIM:FEAT_DIM + NUM_LABELED]
    logits_unl  = slab[:, FEAT_DIM + NUM_LABELED:FEAT_DIM + NUM_COS]
    logits_lin  = slab[:, FEAT_DIM + NUM_COS:]
    return feats, logits_lab, logits_unl, logits_lin


def init_params(key):
    k = jax.random.split(key, 5)
    w_enc   = 0.1 * jax.random.normal(k[0], (C_IN, FEAT_DIM), jnp.float32)        # encoder stub
    w_lab   = 0.1 * jax.random.normal(k[1], (FEAT_DIM, NUM_LABELED), jnp.float32) # head_lab.prototypes.kernel
    w_unlab = 0.1 * jax.random.normal(k[2], (FEAT_DIM, NUM_UNLABELED), jnp.float32)
    w_emb   = 0.1 * jax.random.normal(k[3], (FEAT_DIM, DH), jnp.float32)          # EP.embedding.kernel
    # EP fixed equiangular prototype matrix M
    a = np.asarray(jax.random.uniform(k[4], (DH, NUM_UNLABELED), jnp.float32), dtype=np.float64)
    P, _ = np.linalg.qr(a)                                                        # [DH, U], orthonormal cols
    assert np.allclose(P.T @ P, np.eye(NUM_UNLABELED), atol=1e-6)
    I = np.eye(NUM_UNLABELED)
    one = np.ones((NUM_UNLABELED, NUM_UNLABELED))
    M = np.sqrt(NUM_UNLABELED / (NUM_UNLABELED - 1)) * (P @ (I - one / NUM_UNLABELED))
    return dict(w_enc=w_enc, w_lab=w_lab, w_unlab=w_unlab, w_emb=w_emb,
                M=jnp.asarray(M, jnp.float32))


def minkunet_forward(views, params, discover=True):
    """Mirrors MinkUnet.forward: single sparse tensor or list of views."""
    def pack(feats, l_lab, l_unlab, l_lin):
        out = {"logits_lab": l_lab}
        if discover:
            out.update({"logits_unlab": l_unlab,
                        "logits_unlab_linear": l_lin,
                        "proj_feats_unlab": feats})
        out["feats"] = feats
        return out

    if isinstance(views, (list, tuple)):
        # batch all views through ONE pallas_call (per-point ops are independent),
        # then reshape back to the torch.stack layout [V, N, ...].
        v = len(views)
        n = views[0].shape[0]
        x_flat = jnp.concatenate([jnp.asarray(xv) for xv in views], axis=0)
        feats, l_lab, l_unlab, l_lin = _heads_call(
            x_flat, params["w_enc"], params["w_lab"], params["w_unlab"],
            params["w_emb"], params["M"])
        rs = lambda a: a.reshape(v, n, a.shape[-1])
        return pack(rs(feats), rs(l_lab), rs(l_unlab), rs(l_lin))

    feats, l_lab, l_unlab, l_lin = _heads_call(
        views, params["w_enc"], params["w_lab"], params["w_unlab"],
        params["w_emb"], params["M"])
    return pack(feats, l_lab, l_unlab, l_lin)


def _reference_forward(x, p):
    """Pure-JAX reference of the same semantics (for correctness check)."""
    def rown(v): return v / jnp.maximum(jnp.linalg.norm(v, axis=1, keepdims=True), EPS)
    def coln(v): return v / jnp.maximum(jnp.linalg.norm(v, axis=0, keepdims=True), EPS)
    feats = x * p["w_enc"]
    xn = rown(feats)
    out = {
        "feats": feats,
        "proj_feats_unlab": feats,
        "logits_lab": xn @ coln(p["w_lab"]),
        "logits_unlab": xn @ coln(p["w_unlab"]),
    }
    e = jnp.maximum(feats @ p["w_emb"], 0.0)
    out["logits_unlab_linear"] = rown(e) @ coln(p["M"])
    return out


if __name__ == "__main__":
    key = jax.random.PRNGKey(0)
    k_in1, k_in2, k_par = jax.random.split(key, 3)
    params = init_params(k_par)
    # per-point input features of the sparse tensor (1 input channel)
    x1 = jax.random.normal(k_in1, (N_POINTS, C_IN), jnp.float32)
    x2 = jax.random.normal(k_in2, (N_POINTS, C_IN), jnp.float32)

    names = ["feats", "logits_lab", "logits_unlab",
             "logits_unlab_linear", "proj_feats_unlab"]

    # --- single sparse tensor ---
    out = minkunet_forward(x1, params)
    out = jax.tree_util.tree_map(jax.block_until_ready, out)
    ref = _reference_forward(x1, params)
    for name in names:
        np.testing.assert_allclose(np.asarray(out[name]), np.asarray(ref[name]),
                                   rtol=1e-4, atol=1e-4)
        assert out[name].shape == ref[name].shape

    # --- multi-view list -> one batched pallas_call ---
    out_v = minkunet_forward([x1, x2], params)
    out_v = jax.tree_util.tree_map(jax.block_until_ready, out_v)
    for vi, xv in enumerate([x1, x2]):
        ref_v = _reference_forward(xv, params)
        for name in names:
            np.testing.assert_allclose(np.asarray(out_v[name][vi]),
                                       np.asarray(ref_v[name]),
                                       rtol=1e-4, atol=1e-4)
    assert out_v["feats"].shape == (2, N_POINTS, FEAT_DIM)

    print("KERNEL_OK")
</pallas_src>

<mosaic_0001>
module attributes {stable_mosaic.version = 11 : i64} {
  func.func @_heads_kernel(%arg0: i32, %arg1: memref<128x1xf32, #tpu.memory_space<vmem>>, %arg2: memref<1x96xf32, #tpu.memory_space<vmem>>, %arg3: memref<96x72xf32, #tpu.memory_space<vmem>>, %arg4: memref<48x8xf32, #tpu.memory_space<vmem>>, %arg5: memref<128x128xf32, #tpu.memory_space<vmem>>) attributes {dimension_semantics = [#tpu.dimension_semantics<parallel>], iteration_bounds = array<i64: 1>, scalar_prefetch = 0 : i64, scratch_operands = 0 : i64, tpu.core_type = #tpu.core_type<tc>, window_params = [{transform_indices = @transform_0, window_bounds = array<i64: 128, 1>}, {pipeline_mode = #tpu.pipeline_mode<synchronous>, transform_indices = @transform_1, window_bounds = array<i64: 1, 96>}, {pipeline_mode = #tpu.pipeline_mode<synchronous>, transform_indices = @transform_2, window_bounds = array<i64: 96, 72>}, {pipeline_mode = #tpu.pipeline_mode<synchronous>, transform_indices = @transform_3, window_bounds = array<i64: 48, 8>}, {transform_indices = @transform_4, window_bounds = array<i64: 128, 128>}]} {
    %c0 = arith.constant 0 : index
    %c0_0 = arith.constant 0 : index
    %0 = vector.load %arg1[%c0, %c0_0] : memref<128x1xf32, #tpu.memory_space<vmem>>, vector<128x1xf32>
    %c0_1 = arith.constant 0 : index
    %c0_2 = arith.constant 0 : index
    %1 = vector.load %arg2[%c0_1, %c0_2] : memref<1x96xf32, #tpu.memory_space<vmem>>, vector<1x96xf32>
    %2 = vector.broadcast %0 : vector<128x1xf32> to vector<128x96xf32>
    %3 = vector.broadcast %1 : vector<1x96xf32> to vector<128x96xf32>
    %4 = arith.mulf %2, %3 : vector<128x96xf32>
    %c0_3 = arith.constant 0 : index
    %c0_4 = arith.constant 0 : index
    %5 = vector.load %arg3[%c0_3, %c0_4] : memref<96x72xf32, #tpu.memory_space<vmem>>, vector<96x72xf32>
    %cst = arith.constant dense<0.000000e+00> : vector<128x72xf32>
    %6 = tpu.matmul %4, %5, %cst {dimension_numbers = #tpu.dot_dimension_numbers<[1], [0], [0], [1], [0, 0, 1, 1], [], []>} : vector<128x96xf32>, vector<96x72xf32>, vector<128x72xf32> -> vector<128x72xf32>
    %7 = arith.mulf %4, %4 : vector<128x96xf32>
    %cst_5 = arith.constant dense<0.000000e+00> : vector<128xf32>
    %8 = vector.multi_reduction <add>, %7, %cst_5 [1] : vector<128x96xf32> to vector<128xf32>
    %9 = vector.shape_cast %8 : vector<128xf32> to vector<128x1xf32>
    %cst_6 = arith.constant 1.000000e-24 : f32
    %10 = vector.broadcast %cst_6 : f32 to vector<128x1xf32>
    %11 = arith.maximumf %9, %10 : vector<128x1xf32>
    %12 = math.rsqrt %11 : vector<128x1xf32>
    %13 = vector.extract_strided_slice %6 {offsets = [0, 0], sizes = [128, 24], strides = [1, 1]} : vector<128x72xf32> to vector<128x24xf32>
    %14 = vector.broadcast %12 : vector<128x1xf32> to vector<128x24xf32>
    %15 = arith.mulf %13, %14 : vector<128x24xf32>
    %16 = vector.extract_strided_slice %6 {offsets = [0, 24], sizes = [128, 48], strides = [1, 1]} : vector<128x72xf32> to vector<128x48xf32>
    %cst_7 = arith.constant 0.000000e+00 : f32
    %17 = vector.broadcast %cst_7 : f32 to vector<128x48xf32>
    %18 = arith.maximumf %16, %17 : vector<128x48xf32>
    %19 = arith.mulf %18, %18 : vector<128x48xf32>
    %cst_8 = arith.constant dense<0.000000e+00> : vector<128xf32>
    %20 = vector.multi_reduction <add>, %19, %cst_8 [1] : vector<128x48xf32> to vector<128xf32>
    %21 = vector.shape_cast %20 : vector<128xf32> to vector<128x1xf32>
    %cst_9 = arith.constant 1.000000e-24 : f32
    %22 = vector.broadcast %cst_9 : f32 to vector<128x1xf32>
    %23 = arith.maximumf %21, %22 : vector<128x1xf32>
    %24 = math.rsqrt %23 : vector<128x1xf32>
    %c0_10 = arith.constant 0 : index
    %c0_11 = arith.constant 0 : index
    %25 = vector.load %arg4[%c0_10, %c0_11] : memref<48x8xf32, #tpu.memory_space<vmem>>, vector<48x8xf32>
    %cst_12 = arith.constant dense<0.000000e+00> : vector<128x8xf32>
    %26 = tpu.matmul %18, %25, %cst_12 {dimension_numbers = #tpu.dot_dimension_numbers<[1], [0], [0], [1], [0, 0, 1, 1], [], []>} : vector<128x48xf32>, vector<48x8xf32>, vector<128x8xf32> -> vector<128x8xf32>
    %27 = vector.broadcast %24 : vector<128x1xf32> to vector<128x8xf32>
    %28 = arith.mulf %26, %27 : vector<128x8xf32>
    %c0_13 = arith.constant 0 : index
    %c0_14 = arith.constant 0 : index
    %29 = vector.load %arg5[%c0_13, %c0_14] : memref<128x128xf32, #tpu.memory_space<vmem>>, vector<128x96xf32>
    tpu.vector_store %arg5[%c0_13, %c0_14], %4 {strides = array<i32>} : memref<128x128xf32, #tpu.memory_space<vmem>>, vector<128x96xf32>,
    %c0_15 = arith.constant 0 : index
    %c96 = arith.constant 96 : index
    %30 = vector.load %arg5[%c0_15, %c96] : memref<128x128xf32, #tpu.memory_space<vmem>>, vector<128x24xf32>
    tpu.vector_store %arg5[%c0_15, %c96], %15 {strides = array<i32>} : memref<128x128xf32, #tpu.memory_space<vmem>>, vector<128x24xf32>,
    %c0_16 = arith.constant 0 : index
    %c120 = arith.constant 120 : index
    %31 = vector.load %arg5[%c0_16, %c120] : memref<128x128xf32, #tpu.memory_space<vmem>>, vector<128x8xf32>
    tpu.vector_store %arg5[%c0_16, %c120], %28 {strides = array<i32>} : memref<128x128xf32, #tpu.memory_space<vmem>>, vector<128x8xf32>,
    return
  }
  func.func @transform_0(%arg0: i32) -> (i32, i32) {
    %c0_i32 = arith.constant 0 : i32
    %c0_i32_0 = arith.constant 0 : i32
    return %arg0, %c0_i32 : i32, i32
  }
  func.func @transform_1(%arg0: i32) -> (i32, i32) {
    %c0_i32 = arith.constant 0 : i32
    %c0_i32_0 = arith.constant 0 : i32
    %c0_i32_1 = arith.constant 0 : i32
    return %c0_i32, %c0_i32_0 : i32, i32
  }
  func.func @transform_2(%arg0: i32) -> (i32, i32) {
    %c0_i32 = arith.constant 0 : i32
    %c0_i32_0 = arith.constant 0 : i32
    %c0_i32_1 = arith.constant 0 : i32
    return %c0_i32, %c0_i32_0 : i32, i32
  }
  func.func @transform_3(%arg0: i32) -> (i32, i32) {
    %c0_i32 = arith.constant 0 : i32
    %c0_i32_0 = arith.constant 0 : i32
    %c0_i32_1 = arith.constant 0 : i32
    return %c0_i32, %c0_i32_0 : i32, i32
  }
  func.func @transform_4(%arg0: i32) -> (i32, i32) {
    %c0_i32 = arith.constant 0 : i32
    %c0_i32_0 = arith.constant 0 : i32
    return %arg0, %c0_i32 : i32, i32
  }
}

</mosaic_0001>

<bundles_post_ra>
// kernel: _heads_call.1
= control target key start
LH: loop header
LB: loop body
LE: loop exit
PB: predicated region body
PF: predicated region fallthrough
CT: control target
= control target key end

     0   :  { %v1333_v0 = vmov 0   ;;  %vm148_vm0 = vcmask 785408   ;;  %s1334_s7 = smov 104   ;;  %vm550_vm1 = vcmask 392192   ;;  %s1336_s8 = smov 120   ;;  %vm958_vm2 = vcmask 982784   ;;  %s1948_s0 = inlined_call_operand.vmem [shape: f32[128,1], index: 0, kind: input, shape index: {}]   ;;  %s1949_s2 = inlined_call_operand.vmem [shape: f32[96,72], index: 2, kind: input, shape index: {}]   ;;  %s1950_s1 = inlined_call_operand.vmem [shape: f32[1,96], index: 1, kind: input, shape index: {}]   ;;  %s1951_s4 = inlined_call_operand.vmem [shape: f32[128,128], index: 4, kind: output, shape index: {}]   ;;  %s1952_s3 = inlined_call_operand.vmem [shape: f32[48,8], index: 3, kind: input, shape index: {}]  }
   0x1   :  { %1268 = vset.pattern.permute.xlu1 %v1333_v0  ;;  %1267 = vset.pattern.permute.xlu0 %v1333_v0  ;;  %v19_v1 = vld [vmem:[%s1948_s0 + $0x10] sm:$0xff]  ;;  %v17_v2 = vld [vmem:[%s1948_s0] sm:$0xff]  ;;  %v20_v3 = vld [vmem:[%s1948_s0 + $0x18] sm:$0xff]  ;;  %vm1039_vm3 = vcmask 1048512  }
   0x2   :  { %46 = vperm.xlu1 %1268, %v19_v1   ;;  %36 = vperm.xlu0 %1267, %v17_v2   ;;  %v18_v4 = vld [vmem:[%s1948_s0 + $0x8] sm:$0xff]  ;;  %v136_v6 = vld [vmem:[%s1949_s2] sm:$0xff]  ;;  %v138_v10 = vld [vmem:[%s1949_s2 + $0x10] sm:$0xff] }
   0x3   :  { %v22_v5 = vld [vmem:[%s1948_s0 + $0x28] sm:$0xff]  ;;  %v21_v8 = vld [vmem:[%s1948_s0 + $0x20] sm:$0xff]  ;;  %v139_v11 = vld [vmem:[%s1949_s2 + $0x18] sm:$0xff] }
   0x4   :  { %v137_v7 = vld [vmem:[%s1949_s2 + $0x8] sm:$0xff]  ;;  %v1231_v12 = vpack.c.bf16 %v139_v11, %v138_v10  ;;  %v140_v13 = vld [vmem:[%s1949_s2 + $0x20] sm:$0xff]  ;;  %v24_v15 = vld [vmem:[%s1948_s0 + $0x38] sm:$0xff] }
   0x5   :  { %v1227_v9 = vpack.c.bf16 %v137_v7, %v136_v6  ;;  %v141_v14 = vld [vmem:[%s1949_s2 + $0x28] sm:$0xff]  ;;  %v23_v16 = vld [vmem:[%s1948_s0 + $0x30] sm:$0xff]  ;;  %v143_v19 = vld [vmem:[%s1949_s2 + $0x38] sm:$0xff] }
   0x6   :  { %51 = vperm.xlu1 %1268, %v20_v3   ;;  %41 = vperm.xlu0 %1267, %v18_v4   ;;  %v1235_v17 = vpack.c.bf16 %v141_v14, %v140_v13  ;;  %v142_v18 = vld [vmem:[%s1949_s2 + $0x30] sm:$0xff]  ;;  %v26_v20 = vld [vmem:[%s1948_s0 + $0x48] sm:$0xff]  ;;  %v25_v21 = vld [vmem:[%s1948_s0 + $0x40] sm:$0xff] }
   0x7   :  { %1228 = vmatprep.subr.bf16.mxu0 %v1227_v9  ;;  %v1239_v22 = vpack.c.bf16 %v143_v19, %v142_v18  ;;  %v144_v23 = vld [vmem:[%s1949_s2 + $0x40] sm:$0xff]  ;;  %v145_v24 = vld [vmem:[%s1949_s2 + $0x48] sm:$0xff]  ;;  %v28_v25 = vld [vmem:[%s1948_s0 + $0x58] sm:$0xff] }
   0x8   :  { %1230 = vmatpush3.bf16.msra.mxu0 %v1227_v9  ;;  %v27_v26 = vld [vmem:[%s1948_s0 + $0x50] sm:$0xff]  ;;  %v1243_v27 = vpack.c.bf16 %v145_v24, %v144_v23  ;;  %v147_v29 = vld [vmem:[%s1949_s2 + $0x58] sm:$0xff]  ;;  %v30_v30 = vld [vmem:[%s1948_s0 + $0x68] sm:$0xff] }
   0x9   :  { %1232 = vmatprep.subr.bf16.mxu0 %v1231_v12  ;;  %v146_v28 = vld [vmem:[%s1949_s2 + $0x50] sm:$0xff]  ;;  %v29_v31 = vld [vmem:[%s1948_s0 + $0x60] sm:$0xff]  ;;  %v32_v33 = vld [vmem:[%s1948_s0 + $0x78] sm:$0xff] }
   0xa   :  { %61 = vperm.xlu1 %1268, %v22_v5   ;;  %56 = vperm.xlu0 %1267, %v21_v8   ;;  %v1247_v32 = vpack.c.bf16 %v147_v29, %v146_v28  ;;  %v31_v34 = vld [vmem:[%s1948_s0 + $0x70] sm:$0xff]  ;;  %v1449_v35 = vld [vmem:[%s1950_s1] ss:$0 sm:$0xff] }
   0xc   :  { %1234 = vmatpush3.bf16.msra.mxu0 %v1231_v12 }
   0xd   :  { %1236 = vmatprep.subr.bf16.mxu0 %v1235_v17 }
   0xe   :  { %71 = vperm.xlu1 %1268, %v24_v15   ;;  %66 = vperm.xlu0 %1267, %v23_v16  }
  0x10   :  { %1238 = vmatpush3.bf16.msra.mxu0 %v1235_v17 }
  0x11   :  { %1240 = vmatprep.subr.bf16.mxu0 %v1239_v22 }
  0x12   :  { %81 = vperm.xlu1 %1268, %v26_v20   ;;  %76 = vperm.xlu0 %1267, %v25_v21  }
  0x14   :  { %1242 = vmatpush3.bf16.msra.mxu0 %v1239_v22 }
  0x15   :  { %1244 = vmatprep.subr.bf16.mxu0 %v1243_v27 }
  0x16   :  { %91 = vperm.xlu1 %1268, %v28_v25   ;;  %86 = vperm.xlu0 %1267, %v27_v26  }
  0x18   :  { %1246 = vmatpush3.bf16.msra.mxu0 %v1243_v27 }
  0x19   :  { %1248 = vmatprep.subr.bf16.mxu0 %v1247_v32 }
  0x1a   :  { %101 = vperm.xlu1 %1268, %v30_v30   ;;  %96 = vperm.xlu0 %1267, %v29_v31  }
  0x1c   :  { %1250 = vmatpush3.bf16.msra.mxu0 %v1247_v32 }
  0x1e   :  { %111 = vperm.xlu1 %1268, %v32_v33   ;;  %106 = vperm.xlu0 %1267, %v31_v34  }
  0x81   :  { %v47_v36 = vpop.permute.xlu1 %46  ;;  %v37_v37 = vpop.permute.xlu0 %36 }
  0x82   :  { %v122_v38 = vmul.f32 %v1449_v35, %v47_v36  ;;  %v120_v39 = vmul.f32 %v1449_v35, %v37_v37  ;;  %v631_v36 = vld [vmem:[%s1952_s3] sm:$0xff]  ;;  %v632_v37 = vld [vmem:[%s1952_s3 + $0x8] sm:$0xff] }
  0x84   :  { %880 = vst.msk [vmem:[%s1951_s4 + $0x10] sm:$0xff] %vm148_vm0, %v122_v38  ;;  %878 = vst.msk [vmem:[%s1951_s4] sm:$0xff] %vm148_vm0, %v120_v39  ;;  %1167 = vmatprep.mubr.msk.f32.mxu0 %vm148_vm0, %v120_v39  ;;  %v342_v40 = vmul.f32 %v120_v39, %v120_v39  ;;  %v344_v41 = vmul.f32 %v122_v38, %v122_v38  ;;  %v1251_v39 = vpack.c.bf16 %v632_v37, %v631_v36 }
  0x85   :  { %v52_v42 = vpop.permute.xlu1 %51  ;;  %v42_v43 = vpop.permute.xlu0 %41 }
  0x86   :  { %v123_v44 = vmul.f32 %v1449_v35, %v52_v42  ;;  %v121_v45 = vmul.f32 %v1449_v35, %v42_v43  ;;  %v1465_v46 = vsel %vm148_vm0, %v342_v40, 0.0  ;;  %v1468_v47 = vsel %vm148_vm0, %v344_v41, 0.0  ;;  %v634_v40 = vld [vmem:[%s1952_s3 + $0x18] sm:$0xff]  ;;  %v635_v42 = vld [vmem:[%s1952_s3 + $0x20] sm:$0xff]  ;;  %v636_v43 = vld [vmem:[%s1952_s3 + $0x28] sm:$0xff]  ;;  %1252 = vmatprep.subr.bf16.mxu1 %v1251_v39 }
  0x87   :  { %1254 = vmatpush3.bf16.msra.mxu1 %v1251_v39 }
  0x88   :  { %881 = vst.msk [vmem:[%s1951_s4 + $0x18] sm:$0xff] %vm148_vm0, %v123_v44  ;;  %879 = vst.msk [vmem:[%s1951_s4 + $0x8] sm:$0xff] %vm148_vm0, %v121_v45  ;;  %1168 = vmatmul.mubr.msk.f32.vlgmr.msra.gmra.mrb[0].mxu0 %vm148_vm0, %v121_v45  ;;  %v343_v48 = vmul.f32 %v121_v45, %v121_v45  ;;  %v345_v49 = vmul.f32 %v123_v44, %v123_v44 }
  0x89   :  { %v62_v50 = vpop.permute.xlu1 %61  ;;  %1170 = vmatprep.mubr.msk.f32.mxu0 %vm148_vm0, %v122_v38  ;;  %v57_v51 = vpop.permute.xlu0 %56  ;;  %v633_v38 = vld [vmem:[%s1952_s3 + $0x10] sm:$0xff]  ;;  %s1335_s3 = smov 96  }
  0x8a   :  { %v125_v52 = vmul.f32 %v1449_v35, %v62_v50  ;;  %v124_v53 = vmul.f32 %v1449_v35, %v57_v51  ;;  %v1483_v54 = vsel %vm148_vm0, %v343_v48, 0.0  ;;  %v1486_v55 = vsel %vm148_vm0, %v345_v49, 0.0 }
  0x8b   :  { %v1255_v41 = vpack.c.bf16 %v634_v40, %v633_v38 }
  0x8c   :  { %883 = vst.msk [vmem:[%s1951_s4 + $0x28] sm:$0xff] %vm148_vm0, %v125_v52  ;;  %882 = vst.msk [vmem:[%s1951_s4 + $0x20] sm:$0xff] %vm148_vm0, %v124_v53  ;;  %1171 = vmatmul.mubr.msk.f32.gmra.mrb[2].mxu0 %vm148_vm0, %v123_v44  ;;  %v347_v56 = vmul.f32 %v125_v52, %v125_v52  ;;  %v346_v57 = vmul.f32 %v124_v53, %v124_v53  ;;  %v1259_v44 = vpack.c.bf16 %v636_v43, %v635_v42 }
  0x8d   :  { %v72_v58 = vpop.permute.xlu1 %71  ;;  %1173 = vmatprep.mubr.msk.f32.mxu0 %vm148_vm0, %v124_v53  ;;  %v67_v59 = vpop.permute.xlu0 %66  ;;  %1256 = vmatprep.subr.bf16.mxu1 %v1255_v41 }
  0x8e   :  { %v127_v60 = vmul.f32 %v1449_v35, %v72_v58  ;;  %v126_v61 = vmul.f32 %v1449_v35, %v67_v59  ;;  %v1501_v62 = vsel %vm148_vm0, %v347_v56, 0.0  ;;  %v1504_v63 = vsel %vm148_vm0, %v346_v57, 0.0  ;;  %1258 = vmatpush3.bf16.msra.mxu1 %v1255_v41 }
  0x8f   :  { %1260 = vmatprep.subr.bf16.mxu1 %v1259_v44 }
  0x90   :  { %885 = vst.msk [vmem:[%s1951_s4 + $0x38] sm:$0xff] %vm148_vm0, %v127_v60  ;;  %884 = vst.msk [vmem:[%s1951_s4 + $0x30] sm:$0xff] %vm148_vm0, %v126_v61  ;;  %1174 = vmatmul.mubr.msk.f32.gmra.mrb[4].mxu0 %vm148_vm0, %v125_v52  ;;  %v349_v0 = vmul.f32 %v127_v60, %v127_v60  ;;  %v348_v1 = vmul.f32 %v126_v61, %v126_v61 }
  0x91   :  { %v82_v2 = vpop.permute.xlu1 %81  ;;  %1176 = vmatprep.mubr.msk.f32.mxu0 %vm148_vm0, %v126_v61  ;;  %v77_v3 = vpop.permute.xlu0 %76 }
  0x92   :  { %v129_v4 = vmul.f32 %v1449_v35, %v82_v2  ;;  %v128_v5 = vmul.f32 %v1449_v35, %v77_v3  ;;  %v1519_v6 = vsel %vm148_vm0, %v349_v0, 0.0  ;;  %v1522_v7 = vsel %vm148_vm0, %v348_v1, 0.0  ;;  %1262 = vmatpush3.bf16.msra.mxu1 %v1259_v44 }
  0x94   :  { %887 = vst.msk [vmem:[%s1951_s4 + $0x48] sm:$0xff] %vm148_vm0, %v129_v4  ;;  %886 = vst.msk [vmem:[%s1951_s4 + $0x40] sm:$0xff] %vm148_vm0, %v128_v5  ;;  %1177 = vmatmul.mubr.msk.f32.gmra.mrb[6].mxu0 %vm148_vm0, %v127_v60  ;;  %v351_v8 = vmul.f32 %v129_v4, %v129_v4  ;;  %v350_v9 = vmul.f32 %v128_v5, %v128_v5 }
  0x95   :  { %v92_v10 = vpop.permute.xlu1 %91  ;;  %1179 = vmatprep.mubr.msk.f32.mxu0 %vm148_vm0, %v128_v5  ;;  %v87_v11 = vpop.permute.xlu0 %86 }
  0x96   :  { %v131_v12 = vmul.f32 %v1449_v35, %v92_v10  ;;  %v130_v13 = vmul.f32 %v1449_v35, %v87_v11  ;;  %v1537_v14 = vsel %vm148_vm0, %v351_v8, 0.0  ;;  %v1540_v15 = vsel %vm148_vm0, %v350_v9, 0.0 }
  0x98   :  { %889 = vst.msk [vmem:[%s1951_s4 + $0x58] sm:$0xff] %vm148_vm0, %v131_v12  ;;  %888 = vst.msk [vmem:[%s1951_s4 + $0x50] sm:$0xff] %vm148_vm0, %v130_v13  ;;  %1180 = vmatmul.mubr.msk.f32.gmra.mrb[8].mxu0 %vm148_vm0, %v129_v4  ;;  %v353_v16 = vmul.f32 %v131_v12, %v131_v12  ;;  %v352_v17 = vmul.f32 %v130_v13, %v130_v13 }
  0x99   :  { %v102_v18 = vpop.permute.xlu1 %101  ;;  %1182 = vmatprep.mubr.msk.f32.mxu0 %vm148_vm0, %v130_v13  ;;  %v97_v19 = vpop.permute.xlu0 %96 }
  0x9a   :  { %v133_v20 = vmul.f32 %v1449_v35, %v102_v18  ;;  %v132_v21 = vmul.f32 %v1449_v35, %v97_v19  ;;  %v1555_v22 = vsel %vm148_vm0, %v353_v16, 0.0  ;;  %v1558_v23 = vsel %vm148_vm0, %v352_v17, 0.0 }
  0x9c   :  { %891 = vst.msk [vmem:[%s1951_s4 + $0x68] sm:$0xff] %vm148_vm0, %v133_v20  ;;  %890 = vst.msk [vmem:[%s1951_s4 + $0x60] sm:$0xff] %vm148_vm0, %v132_v21  ;;  %1183 = vmatmul.mubr.msk.f32.gmra.mrb[10].mxu0 %vm148_vm0, %v131_v12  ;;  %v355_v24 = vmul.f32 %v133_v20, %v133_v20  ;;  %v354_v25 = vmul.f32 %v132_v21, %v132_v21 }
  0x9d   :  { %v112_v26 = vpop.permute.xlu1 %111  ;;  %1185 = vmatprep.mubr.msk.f32.mxu0 %vm148_vm0, %v132_v21  ;;  %v107_v27 = vpop.permute.xlu0 %106 }
  0x9e   :  { %v135_v28 = vmul.f32 %v1449_v35, %v112_v26  ;;  %v134_v29 = vmul.f32 %v1449_v35, %v107_v27  ;;  %v1573_v30 = vsel %vm148_vm0, %v355_v24, 0.0  ;;  %v1576_v31 = vsel %vm148_vm0, %v354_v25, 0.0 }
  0xa0   :  { %893 = vst.msk [vmem:[%s1951_s4 + $0x78] sm:$0xff] %vm148_vm0, %v135_v28  ;;  %892 = vst.msk [vmem:[%s1951_s4 + $0x70] sm:$0xff] %vm148_vm0, %v134_v29  ;;  %1186 = vmatmul.mubr.msk.f32.gmra.mrb[12].mxu0 %vm148_vm0, %v133_v20  ;;  %v357_v32 = vmul.f32 %v135_v28, %v135_v28  ;;  %v356_v33 = vmul.f32 %v134_v29, %v134_v29 }
  0xa1   :  { %1188 = vmatprep.mubr.msk.f32.mxu0 %vm148_vm0, %v134_v29 }
  0xa2   :  { %v1589_v34 = vsel %vm148_vm0, %v357_v32, 0.0  ;;  %v1592_v35 = vsel %vm148_vm0, %v356_v33, 0.0 }
  0xa4   :  { %1189 = vmatmul.mubr.msk.f32.gmra.mrb[14].mxu0 %vm148_vm0, %v135_v28 }
 0x15b   :  { %v1613_v45 = vpop.f32.mrb[0].mxu0 }
 0x15c   :  { %v455_v48 = vmax.f32 %v1613_v45, 0.0  ;;  %v1616_v49 = vpop.f32.mrb[1].mxu0 }
 0x15d   :  { %v454_v50 = vmax.f32 %v1616_v49, 0.0 }
 0x15e   :  { %655 = vrot.lane.b32.xlu1 %v455_v48, %s1334_s7  ;;  %v471_v26 = vmul.f32 %v455_v48, %v455_v48 }
 0x15f   :  { %653 = vrot.lane.b32.xlu0 %v454_v50, %s1334_s7  ;;  %v1621_v51 = vpop.f32.mrb[2].mxu0  ;;  %v470_v25 = vmul.f32 %v454_v50, %v454_v50 }
 0x160   :  { %v457_v52 = vmax.f32 %v1621_v51, 0.0  ;;  %v1624_v53 = vpop.f32.mrb[3].mxu0 }
 0x161   :  { %v456_v56 = vmax.f32 %v1624_v53, 0.0 }
 0x162   :  { %659 = vrot.lane.b32.xlu1 %v457_v52, %s1334_s7  ;;  %v473_v28 = vmul.f32 %v457_v52, %v457_v52 }
 0x163   :  { %657 = vrot.lane.b32.xlu0 %v456_v56, %s1334_s7  ;;  %v1629_v57 = vpop.f32.mrb[4].mxu0  ;;  %v472_v27 = vmul.f32 %v456_v56, %v456_v56 }
 0x164   :  { %v459_v58 = vmax.f32 %v1629_v57, 0.0  ;;  %v1632_v59 = vpop.f32.mrb[5].mxu0 }
 0x165   :  { %v458_v60 = vmax.f32 %v1632_v59, 0.0 }
 0x166   :  { %663 = vrot.lane.b32.xlu1 %v459_v58, %s1334_s7  ;;  %v475_v32 = vmul.f32 %v459_v58, %v459_v58 }
 0x167   :  { %661 = vrot.lane.b32.xlu0 %v458_v60, %s1334_s7  ;;  %v1637_v61 = vpop.f32.mrb[6].mxu0  ;;  %v474_v29 = vmul.f32 %v458_v60, %v458_v60 }
 0x168   :  { %v461_v0 = vmax.f32 %v1637_v61, 0.0  ;;  %v1640_v1 = vpop.f32.mrb[7].mxu0 }
 0x169   :  { %v460_v2 = vmax.f32 %v1640_v1, 0.0 }
 0x16a   :  { %667 = vrot.lane.b32.xlu1 %v461_v0, %s1334_s7  ;;  %v477_v36 = vmul.f32 %v461_v0, %v461_v0 }
 0x16b   :  { %665 = vrot.lane.b32.xlu0 %v460_v2, %s1334_s7  ;;  %v1645_v3 = vpop.f32.mrb[8].mxu0  ;;  %v476_v33 = vmul.f32 %v460_v2, %v460_v2 }
 0x16c   :  { %v463_v4 = vmax.f32 %v1645_v3, 0.0  ;;  %v1648_v5 = vpop.f32.mrb[9].mxu0 }
 0x16d   :  { %v462_v8 = vmax.f32 %v1648_v5, 0.0 }
 0x16e   :  { %671 = vrot.lane.b32.xlu1 %v463_v4, %s1334_s7  ;;  %v479_v37 = vmul.f32 %v463_v4, %v463_v4 }
 0x16f   :  { %669 = vrot.lane.b32.xlu0 %v462_v8, %s1334_s7  ;;  %v1653_v9 = vpop.f32.mrb[10].mxu0  ;;  %v478_v42 = vmul.f32 %v462_v8, %v462_v8 }
 0x170   :  { %v465_v10 = vmax.f32 %v1653_v9, 0.0  ;;  %v1656_v11 = vpop.f32.mrb[11].mxu0 }
 0x171   :  { %v464_v12 = vmax.f32 %v1656_v11, 0.0 }
 0x172   :  { %675 = vrot.lane.b32.xlu1 %v465_v10, %s1334_s7  ;;  %v481_v39 = vmul.f32 %v465_v10, %v465_v10 }
 0x173   :  { %673 = vrot.lane.b32.xlu0 %v464_v12, %s1334_s7  ;;  %v1661_v13 = vpop.f32.mrb[12].mxu0  ;;  %v480_v38 = vmul.f32 %v464_v12, %v464_v12 }
 0x174   :  { %v467_v16 = vmax.f32 %v1661_v13, 0.0  ;;  %v1664_v17 = vpop.f32.mrb[13].mxu0 }
 0x175   :  { %v466_v18 = vmax.f32 %v1664_v17, 0.0 }
 0x176   :  { %679 = vrot.lane.b32.xlu1 %v467_v16, %s1334_s7  ;;  %v483_v41 = vmul.f32 %v467_v16, %v467_v16 }
 0x177   :  { %677 = vrot.lane.b32.xlu0 %v466_v18, %s1334_s7  ;;  %v1669_v19 = vpop.f32.mrb[14].mxu0  ;;  %v482_v40 = vmul.f32 %v466_v18, %v466_v18 }
 0x178   :  { %v1672_v20 = vmax.f32 %v1669_v19, 0.0  ;;  %v1674_v21 = vpop.f32.mrb[15].mxu0 }
 0x179   :  { %v1677_v24 = vmax.f32 %v1674_v21, 0.0 }
 0x17a   :  { %683 = vrot.lane.b32.xlu1 %v1672_v20, %s1334_s7 }
 0x17b   :  { %681 = vrot.lane.b32.xlu0 %v1677_v24, %s1334_s7  ;;  %v484_v60 = vmul.f32 %v1677_v24, %v1677_v24 }
 0x17e   :  { %502 = vrot.lane.b32.xlu1 %v470_v25, %s1334_s7 }
 0x182   :  { %504 = vrot.lane.b32.xlu1 %v471_v26, %s1334_s7 }
 0x186   :  { %506 = vrot.lane.b32.xlu1 %v472_v27, %s1334_s7 }
 0x18a   :  { %508 = vrot.lane.b32.xlu1 %v473_v28, %s1334_s7 }
 0x18e   :  { %510 = vrot.lane.b32.xlu1 %v474_v29, %s1334_s7 }
 0x192   :  { %512 = vrot.lane.b32.xlu1 %v475_v32, %s1334_s7 }
 0x196   :  { %514 = vrot.lane.b32.xlu1 %v476_v33, %s1334_s7 }
 0x19a   :  { %516 = vrot.lane.b32.xlu1 %v477_v36, %s1334_s7  ;;  %359 = vadd.xlane.f32.xlu0 %v1465_v46 }
 0x19e   :  { %520 = vrot.lane.b32.xlu1 %v479_v37, %s1334_s7 }
 0x1a2   :  { %522 = vrot.lane.b32.xlu1 %v480_v38, %s1334_s7 }
 0x1a6   :  { %524 = vrot.lane.b32.xlu1 %v481_v39, %s1334_s7 }
 0x1aa   :  { %526 = vrot.lane.b32.xlu1 %v482_v40, %s1334_s7 }
 0x1ae   :  { %528 = vrot.lane.b32.xlu1 %v483_v41, %s1334_s7 }
 0x1b0   :  { %518 = vrot.lane.b32.xlu0 %v478_v42, %s1334_s7 }
 0x1cf   :  { %365 = vadd.xlane.f32.xlu0 %v1468_v47 }
 0x1d0   :  { %v656_v46 = vpop.permute.xlu1 %655 }
 0x1d1   :  { %v654_v43 = vpop.permute.xlu0 %653 }
 0x1d2   :  { %362 = vadd.xlane.f32.xlu1 %v1483_v54  ;;  %1203 = vmatprep.mubr.msk.f32.mxu1 %vm550_vm1, %v654_v43 }
 0x1d3   :  { %368 = vadd.xlane.f32.xlu0 %v1486_v55  ;;  %1204 = vmatmul.mubr.msk.f32.vlgmr.msra.gmra.mrb[0].mxu1 %vm550_vm1, %v656_v46 }
 0x1d4   :  { %v660_v44 = vpop.permute.xlu1 %659 }
 0x1d5   :  { %v658_v48 = vpop.permute.xlu0 %657 }
 0x1d6   :  { %374 = vadd.xlane.f32.xlu1 %v1501_v62  ;;  %1206 = vmatprep.mubr.msk.f32.mxu1 %vm550_vm1, %v658_v48 }
 0x1d7   :  { %371 = vadd.xlane.f32.xlu0 %v1504_v63  ;;  %1207 = vmatmul.mubr.msk.f32.gmra.mrb[2].mxu1 %vm550_vm1, %v660_v44 }
 0x1d8   :  { %v664_v47 = vpop.permute.xlu1 %663 }
 0x1d9   :  { %v662_v50 = vpop.permute.xlu0 %661 }
 0x1da   :  { %380 = vadd.xlane.f32.xlu1 %v1519_v6  ;;  %1209 = vmatprep.mubr.msk.f32.mxu1 %vm550_vm1, %v662_v50 }
 0x1db   :  { %377 = vadd.xlane.f32.xlu0 %v1522_v7  ;;  %1210 = vmatmul.mubr.msk.f32.gmra.mrb[4].mxu1 %vm550_vm1, %v664_v47 }
 0x1dc   :  { %v668_v54 = vpop.permute.xlu1 %667 }
 0x1dd   :  { %v666_v55 = vpop.permute.xlu0 %665 }
 0x1de   :  { %386 = vadd.xlane.f32.xlu1 %v1537_v14  ;;  %1212 = vmatprep.mubr.msk.f32.mxu1 %vm550_vm1, %v666_v55 }
 0x1df   :  { %383 = vadd.xlane.f32.xlu0 %v1540_v15  ;;  %1213 = vmatmul.mubr.msk.f32.gmra.mrb[6].mxu1 %vm550_vm1, %v668_v54 }
 0x1e0   :  { %v672_v62 = vpop.permute.xlu1 %671 }
 0x1e1   :  { %v670_v63 = vpop.permute.xlu0 %669 }
 0x1e2   :  { %392 = vadd.xlane.f32.xlu1 %v1555_v22  ;;  %1215 = vmatprep.mubr.msk.f32.mxu1 %vm550_vm1, %v670_v63 }
 0x1e3   :  { %1216 = vmatmul.mubr.msk.f32.gmra.mrb[8].mxu1 %vm550_vm1, %v672_v62 }
 0x1e4   :  { %v676_v6 = vpop.permute.xlu1 %675 }
 0x1e5   :  { %v674_v7 = vpop.permute.xlu0 %673 }
 0x1e6   :  { %398 = vadd.xlane.f32.xlu1 %v1573_v30  ;;  %1218 = vmatprep.mubr.msk.f32.mxu1 %vm550_vm1, %v674_v7  ;;  %v485_v30 = vmul.f32 %v1672_v20, %v1672_v20 }
 0x1e7   :  { %1219 = vmatmul.mubr.msk.f32.gmra.mrb[10].mxu1 %vm550_vm1, %v676_v6 }
 0x1e8   :  { %v680_v14 = vpop.permute.xlu1 %679 }
 0x1e9   :  { %v678_v15 = vpop.permute.xlu0 %677 }
 0x1ea   :  { %1221 = vmatprep.mubr.msk.f32.mxu1 %vm550_vm1, %v678_v15 }
 0x1eb   :  { %1222 = vmatmul.mubr.msk.f32.gmra.mrb[12].mxu1 %vm550_vm1, %v680_v14 }
 0x1ec   :  { %v684_v52 = vpop.permute.xlu1 %683 }
 0x1ed   :  { %v682_v22 = vpop.permute.xlu0 %681 }
 0x1ee   :  { %1224 = vmatprep.mubr.msk.f32.mxu1 %vm550_vm1, %v682_v22 }
 0x1ef   :  { %1225 = vmatmul.mubr.msk.f32.gmra.mrb[14].mxu1 %vm550_vm1, %v684_v52 }
 0x1f0   :  { %v503_v56 = vpop.permute.xlu1 %502 }
 0x1f1   :  { %v551_v20 = vsel %vm550_vm1, %v503_v56, 0.0 }
 0x1f4   :  { %v505_v58 = vpop.permute.xlu1 %504 }
 0x1f5   :  { %532 = vrot.lane.b32.xlu0 %v485_v30, %s1334_s7  ;;  %v554_v18 = vsel %vm550_vm1, %v505_v58, 0.0 }
 0x1f7   :  { %530 = vrot.lane.b32.xlu1 %v484_v60, %s1334_s7 }
 0x1f8   :  { %v507_v0 = vpop.permute.xlu1 %506 }
 0x1fc   :  { %v509_v2 = vpop.permute.xlu1 %508 }
 0x1fd   :  { %v560_v25 = vsel %vm550_vm1, %v509_v2, 0.0 }
 0x200   :  { %v511_v4 = vpop.permute.xlu1 %510 }
 0x204   :  { %v513_v8 = vpop.permute.xlu1 %512 }
 0x208   :  { %v515_v10 = vpop.permute.xlu1 %514 }
 0x209   :  { %v569_v29 = vsel %vm550_vm1, %v515_v10, 0.0 }
 0x20c   :  { %v517_v12 = vpop.permute.xlu1 %516 }
 0x20d   :  { %v572_v28 = vsel %vm550_vm1, %v517_v12, 0.0 }
 0x210   :  { %v521_v16 = vpop.permute.xlu1 %520 }
 0x211   :  { %v578_v36 = vsel %vm550_vm1, %v521_v16, 0.0 }
 0x214   :  { %389 = vadd.xlane.f32.xlu0 %v1558_v23  ;;  %v523_v24 = vpop.permute.xlu1 %522  ;;  %v557_v23 = vsel %vm550_vm1, %v507_v0, 0.0 }
 0x215   :  { %v581_v40 = vsel %vm550_vm1, %v523_v24, 0.0 }
 0x218   :  { %395 = vadd.xlane.f32.xlu0 %v1576_v31  ;;  %v566_v31 = vsel %vm550_vm1, %v513_v8, 0.0  ;;  %v525_v26 = vpop.permute.xlu1 %524 }
 0x219   :  { %v584_v38 = vsel %vm550_vm1, %v525_v26, 0.0 }
 0x21b   :  { %404 = vadd.xlane.f32.xlu1 %v1589_v34 }
 0x21c   :  { %401 = vadd.xlane.f32.xlu0 %v1592_v35  ;;  %v563_v35 = vsel %vm550_vm1, %v511_v4, 0.0  ;;  %v527_v33 = vpop.permute.xlu1 %526 }
 0x21d   :  { %v587_v43 = vsel %vm550_vm1, %v527_v33, 0.0 }
 0x21f   :  { %555 = vadd.xlane.f32.xlu1 %v554_v18 }
 0x220   :  { %552 = vadd.xlane.f32.xlu0 %v551_v20  ;;  %v529_v39 = vpop.permute.xlu1 %528 }
 0x221   :  { %v590_v46 = vsel %vm550_vm1, %v529_v39, 0.0 }
 0x223   :  { %561 = vadd.xlane.f32.xlu1 %v560_v25 }
 0x224   :  { %558 = vadd.xlane.f32.xlu0 %v557_v23 }
 0x227   :  { %567 = vadd.xlane.f32.xlu1 %v566_v31  ;;  %v360_v34 = vpop.xlane.xlu0 %359 }
 0x228   :  { %v406_v27 = vmax.f32 %v360_v34, 1e-24  ;;  %564 = vadd.xlane.f32.xlu0 %v563_v35 }
 0x22a   :  { %1269 = vrsqrt.f32 %v406_v27 }
 0x22b   :  { %573 = vadd.xlane.f32.xlu1 %v572_v28  ;;  %v519_v32 = vpop.permute.xlu0 %518 }
 0x22c   :  { %570 = vadd.xlane.f32.xlu0 %v569_v29  ;;  %v575_v37 = vsel %vm550_vm1, %v519_v32, 0.0 }
 0x22f   :  { %579 = vadd.xlane.f32.xlu1 %v578_v36 }
 0x230   :  { %576 = vadd.xlane.f32.xlu0 %v575_v37 }
 0x233   :  { %585 = vadd.xlane.f32.xlu1 %v584_v38 }
 0x234   :  { %v1270_v41 = vpop.eup %1269  ;;  %582 = vadd.xlane.f32.xlu0 %v581_v40 }
 0x235   :  { %v438_v42 = vmul.f32 %v1270_v41, %v1616_v49 }
 0x237   :  { %591 = vadd.xlane.f32.xlu1 %v590_v46 }
 0x238   :  { %588 = vadd.xlane.f32.xlu0 %v587_v43 }
 0x25c   :  { %v366_v44 = vpop.xlane.xlu0 %365 }
 0x25d   :  { %v408_v22 = vmax.f32 %v366_v44, 1e-24 }
 0x25f   :  { %v363_v48 = vpop.xlane.xlu1 %362 }
 0x260   :  { %v369_v47 = vpop.xlane.xlu0 %368  ;;  %v407_v14 = vmax.f32 %v363_v48, 1e-24 }
 0x261   :  { %v409_v30 = vmax.f32 %v369_v47, 1e-24 }
 0x262   :  { %1271 = vrsqrt.f32 %v407_v14 }
 0x263   :  { %v375_v50 = vpop.xlane.xlu1 %374  ;;  %1273 = vrsqrt.f32 %v408_v22 }
 0x264   :  { %v372_v54 = vpop.xlane.xlu0 %371  ;;  %1275 = vrsqrt.f32 %v409_v30  ;;  %v411_v60 = vmax.f32 %v375_v50, 1e-24 }
 0x265   :  { %v410_v2 = vmax.f32 %v372_v54, 1e-24 }
 0x266   :  { %1277 = vrsqrt.f32 %v411_v60 }
 0x267   :  { %v381_v55 = vpop.xlane.xlu1 %380  ;;  %1279 = vrsqrt.f32 %v410_v2 }
 0x268   :  { %v378_v62 = vpop.xlane.xlu0 %377  ;;  %v413_v4 = vmax.f32 %v381_v55, 1e-24 }
 0x269   :  { %v412_v12 = vmax.f32 %v378_v62, 1e-24 }
 0x26a   :  { %1281 = vrsqrt.f32 %v413_v4 }
 0x26b   :  { %v387_v63 = vpop.xlane.xlu1 %386  ;;  %1283 = vrsqrt.f32 %v412_v12 }
 0x26c   :  { %v384_v6 = vpop.xlane.xlu0 %383  ;;  %v1272_v0 = vpop.eup %1271  ;;  %v415_v16 = vmax.f32 %v387_v63, 1e-24 }
 0x26d   :  { %v439_v8 = vmul.f32 %v1272_v0, %v1613_v45  ;;  %v1274_v10 = vpop.eup %1273  ;;  %v414_v24 = vmax.f32 %v384_v6, 1e-24 }
 0x26e   :  { %v440_v18 = vmul.f32 %v1274_v10, %v1624_v53  ;;  %v1276_v20 = vpop.eup %1275  ;;  %1285 = vrsqrt.f32 %v415_v16 }
 0x26f   :  { %v393_v7 = vpop.xlane.xlu1 %392  ;;  %v441_v23 = vmul.f32 %v1276_v20, %v1621_v51  ;;  %1287 = vrsqrt.f32 %v414_v24 }
 0x270   :  { %v533_v15 = vpop.permute.xlu0 %532  ;;  %v417_v25 = vmax.f32 %v393_v7, 1e-24  ;;  %v1278_v45 = vpop.eup %1277 }
 0x271   :  { %v596_v49 = vsel %vm550_vm1, %v533_v15, 0.0  ;;  %v1280_v26 = vpop.eup %1279  ;;  %v443_v34 = vmul.f32 %v1278_v45, %v1629_v57 }
 0x272   :  { %597 = vadd.xlane.f32.xlu1 %v596_v49  ;;  %1289 = vrsqrt.f32 %v417_v25  ;;  %v442_v27 = vmul.f32 %v1280_v26, %v1632_v59 }
 0x273   :  { %v399_v52 = vpop.xlane.xlu1 %398 }
 0x274   :  { %v419_v31 = vmax.f32 %v399_v52, 1e-24  ;;  %v1282_v35 = vpop.eup %1281 }
 0x275   :  { %v1284_v53 = vpop.eup %1283  ;;  %v445_v51 = vmul.f32 %v1282_v35, %v1637_v61 }
 0x276   :  { %1291 = vrsqrt.f32 %v419_v31  ;;  %v444_v32 = vmul.f32 %v1284_v53, %v1640_v1 }
 0x277   :  { %v531_v56 = vpop.permute.xlu1 %530 }
 0x278   :  { %v593_v58 = vsel %vm550_vm1, %v531_v56, 0.0  ;;  %v1286_v28 = vpop.eup %1285 }
 0x279   :  { %594 = vadd.xlane.f32.xlu0 %v593_v58  ;;  %v1288_v29 = vpop.eup %1287  ;;  %v447_v57 = vmul.f32 %v1286_v28, %v1645_v3 }
 0x27a   :  { %v446_v36 = vmul.f32 %v1288_v29, %v1648_v5 }
 0x27c   :  { %v1290_v33 = vpop.eup %1289 }
 0x27d   :  { %v449_v59 = vmul.f32 %v1290_v33, %v1653_v9 }
 0x280   :  { %v1292_v61 = vpop.eup %1291 }
 0x281   :  { %v451_v37 = vmul.f32 %v1292_v61, %v1661_v13 }
 0x283   :  { %912 = vrot.lane.b32.xlu1 %v439_v8, %s1335_s3 }
 0x287   :  { %914 = vrot.lane.b32.xlu1 %v440_v18, %s1335_s3 }
 0x28b   :  { %916 = vrot.lane.b32.xlu1 %v441_v23, %s1335_s3 }
 0x28f   :  { %910 = vrot.lane.b32.xlu0 %v438_v42, %s1335_s3  ;;  %920 = vrot.lane.b32.xlu1 %v443_v34, %s1335_s3 }
 0x293   :  { %918 = vrot.lane.b32.xlu0 %v442_v27, %s1335_s3  ;;  %924 = vrot.lane.b32.xlu1 %v445_v51, %s1335_s3 }
 0x297   :  { %922 = vrot.lane.b32.xlu0 %v444_v32, %s1335_s3  ;;  %928 = vrot.lane.b32.xlu1 %v447_v57, %s1335_s3 }
 0x29b   :  { %926 = vrot.lane.b32.xlu0 %v446_v36, %s1335_s3  ;;  %932 = vrot.lane.b32.xlu1 %v449_v59, %s1335_s3 }
 0x29f   :  { %936 = vrot.lane.b32.xlu1 %v451_v37, %s1335_s3 }
 0x2a1   :  { %v390_v1 = vpop.xlane.xlu0 %389 }
 0x2a2   :  { %v416_v3 = vmax.f32 %v390_v1, 1e-24 }
 0x2a4   :  { %1293 = vrsqrt.f32 %v416_v3 }
 0x2a5   :  { %v396_v38 = vpop.xlane.xlu0 %395 }
 0x2a6   :  { %v418_v39 = vmax.f32 %v396_v38, 1e-24  ;;  %v1205_v40 = vpop.f32.mrb[0].mxu1 }
 0x2a7   :  { %v783_v41 = vpop.f32.mrb[1].mxu1 }
 0x2a8   :  { %1295 = vrsqrt.f32 %v418_v39  ;;  %v405_v5 = vpop.xlane.xlu1 %404 }
 0x2a9   :  { %v421_v42 = vmax.f32 %v405_v5, 1e-24  ;;  %v402_v9 = vpop.xlane.xlu0 %401 }
 0x2aa   :  { %v420_v46 = vmax.f32 %v402_v9, 1e-24  ;;  %v1208_v43 = vpop.f32.mrb[2].mxu1 }
 0x2ab   :  { %1297 = vrsqrt.f32 %v421_v42  ;;  %v1775_v44 = vpop.f32.mrb[3].mxu1 }
 0x2ac   :  { %1299 = vrsqrt.f32 %v420_v46  ;;  %v556_v13 = vpop.xlane.xlu1 %555 }
 0x2ad   :  { %v600_v48 = vmax.f32 %v556_v13, 1e-24  ;;  %v553_v47 = vpop.xlane.xlu0 %552 }
 0x2ae   :  { %v1294_v50 = vpop.eup %1293  ;;  %v599_v54 = vmax.f32 %v553_v47, 1e-24  ;;  %v1777_v55 = vpop.f32.mrb[4].mxu1 }
 0x2af   :  { %1301 = vrsqrt.f32 %v600_v48  ;;  %v1779_v62 = vpop.f32.mrb[5].mxu1  ;;  %v448_v63 = vmul.f32 %v1294_v50, %v1656_v11 }
 0x2b0   :  { %1303 = vrsqrt.f32 %v599_v54  ;;  %v562_v6 = vpop.xlane.xlu1 %561 }
 0x2b1   :  { %v602_v7 = vmax.f32 %v562_v6, 1e-24  ;;  %930 = vrot.lane.b32.xlu0 %v448_v63, %s1335_s3  ;;  %v559_v14 = vpop.xlane.xlu0 %558 }
 0x2b2   :  { %v1296_v15 = vpop.eup %1295  ;;  %v601_v49 = vmax.f32 %v559_v14, 1e-24  ;;  %v1783_v52 = vpop.f32.mrb[6].mxu1 }
 0x2b3   :  { %1305 = vrsqrt.f32 %v602_v7  ;;  %v1785_v22 = vpop.f32.mrb[7].mxu1  ;;  %v450_v56 = vmul.f32 %v1296_v15, %v1664_v17 }
 0x2b4   :  { %1307 = vrsqrt.f32 %v601_v49  ;;  %v568_v30 = vpop.xlane.xlu1 %567 }
 0x2b5   :  { %v1298_v58 = vpop.eup %1297  ;;  %v604_v60 = vmax.f32 %v568_v30, 1e-24  ;;  %934 = vrot.lane.b32.xlu0 %v450_v56, %s1335_s3  ;;  %v565_v11 = vpop.xlane.xlu0 %564 }
 0x2b6   :  { %v1300_v0 = vpop.eup %1299  ;;  %v603_v2 = vmax.f32 %v565_v11, 1e-24  ;;  %v1789_v4 = vpop.f32.mrb[8].mxu1  ;;  %v453_v8 = vmul.f32 %v1298_v58, %v1669_v19 }
 0x2b7   :  { %1309 = vrsqrt.f32 %v604_v60  ;;  %v1792_v10 = vpop.f32.mrb[9].mxu1  ;;  %v452_v12 = vmul.f32 %v1300_v0, %v1674_v21 }
 0x2b8   :  { %1311 = vrsqrt.f32 %v603_v2  ;;  %v574_v17 = vpop.xlane.xlu1 %573  ;;  %940 = vrot.lane.b32.xlu1 %v453_v8, %s1335_s3 }
 0x2b9   :  { %v1302_v16 = vpop.eup %1301  ;;  %v606_v18 = vmax.f32 %v574_v17, 1e-24  ;;  %938 = vrot.lane.b32.xlu0 %v452_v12, %s1335_s3  ;;  %v571_v20 = vpop.xlane.xlu0 %570 }
 0x2ba   :  { %v1304_v24 = vpop.eup %1303  ;;  %v605_v25 = vmax.f32 %v571_v20, 1e-24  ;;  %v1220_v23 = vpop.f32.mrb[10].mxu1  ;;  %v863_v45 = vmul.f32 %v1302_v16, %v1205_v40 }
 0x2bb   :  { %1313 = vrsqrt.f32 %v606_v18  ;;  %v833_v19 = vpop.f32.mrb[11].mxu1  ;;  %v862_v31 = vmul.f32 %v1304_v24, %v783_v41 }
 0x2bc   :  { %1315 = vrsqrt.f32 %v605_v25  ;;  %v580_v26 = vpop.xlane.xlu1 %579  ;;  %993 = vrot.lane.b32.xlu1 %v863_v45, %s1336_s8 }
 0x2bd   :  { %v1306_v21 = vpop.eup %1305  ;;  %v608_v34 = vmax.f32 %v580_v26, 1e-24  ;;  %991 = vrot.lane.b32.xlu0 %v862_v31, %s1336_s8  ;;  %v577_v35 = vpop.xlane.xlu0 %576 }
 0x2be   :  { %v1308_v53 = vpop.eup %1307  ;;  %v607_v27 = vmax.f32 %v577_v35, 1e-24  ;;  %v1223_v51 = vpop.f32.mrb[12].mxu1  ;;  %v865_v28 = vmul.f32 %v1306_v21, %v1208_v43 }
 0x2bf   :  { %1317 = vrsqrt.f32 %v608_v34  ;;  %v843_v29 = vpop.f32.mrb[13].mxu1  ;;  %v864_v32 = vmul.f32 %v1308_v53, %v1775_v44 }
 0x2c0   :  { %1319 = vrsqrt.f32 %v607_v27  ;;  %v586_v57 = vpop.xlane.xlu1 %585  ;;  %997 = vrot.lane.b32.xlu1 %v865_v28, %s1336_s8 }
 0x2c1   :  { %v1310_v33 = vpop.eup %1309  ;;  %v610_v36 = vmax.f32 %v586_v57, 1e-24  ;;  %995 = vrot.lane.b32.xlu0 %v864_v32, %s1336_s8  ;;  %v583_v59 = vpop.xlane.xlu0 %582 }
 0x2c2   :  { %v1312_v61 = vpop.eup %1311  ;;  %v609_v37 = vmax.f32 %v583_v59, 1e-24  ;;  %v1226_v1 = vpop.f32.mrb[14].mxu1  ;;  %v867_v3 = vmul.f32 %v1310_v33, %v1777_v55 }
 0x2c3   :  { %1321 = vrsqrt.f32 %v610_v36  ;;  %v853_v38 = vpop.f32.mrb[15].mxu1  ;;  %v866_v39 = vmul.f32 %v1312_v61, %v1779_v62 }
 0x2c4   :  { %1323 = vrsqrt.f32 %v609_v37  ;;  %v592_v40 = vpop.xlane.xlu1 %591  ;;  %1001 = vrot.lane.b32.xlu1 %v867_v3, %s1336_s8 }
 0x2c5   :  { %v1314_v41 = vpop.eup %1313  ;;  %v612_v5 = vmax.f32 %v592_v40, 1e-24  ;;  %999 = vrot.lane.b32.xlu0 %v866_v39, %s1336_s8  ;;  %v589_v42 = vpop.xlane.xlu0 %588 }
 0x2c6   :  { %v1316_v9 = vpop.eup %1315  ;;  %v611_v46 = vmax.f32 %v589_v42, 1e-24  ;;  %v869_v43 = vmul.f32 %v1314_v41, %v1783_v52 }
 0x2c7   :  { %1325 = vrsqrt.f32 %v612_v5  ;;  %v868_v44 = vmul.f32 %v1316_v9, %v1785_v22 }
 0x2c8   :  { %1327 = vrsqrt.f32 %v611_v46  ;;  %1005 = vrot.lane.b32.xlu1 %v869_v43, %s1336_s8 }
 0x2c9   :  { %v1318_v13 = vpop.eup %1317  ;;  %1003 = vrot.lane.b32.xlu0 %v868_v44, %s1336_s8 }
 0x2ca   :  { %v1320_v48 = vpop.eup %1319  ;;  %v871_v47 = vmul.f32 %v1318_v13, %v1789_v4 }
 0x2cb   :  { %v870_v50 = vmul.f32 %v1320_v48, %v1792_v10 }
 0x2cc   :  { %1009 = vrot.lane.b32.xlu1 %v871_v47, %s1336_s8 }
 0x2cd   :  { %v1322_v54 = vpop.eup %1321  ;;  %1007 = vrot.lane.b32.xlu0 %v870_v50, %s1336_s8 }
 0x2ce   :  { %v1324_v55 = vpop.eup %1323  ;;  %v873_v62 = vmul.f32 %v1322_v54, %v1220_v23 }
 0x2cf   :  { %v872_v63 = vmul.f32 %v1324_v55, %v833_v19 }
 0x2d0   :  { %1013 = vrot.lane.b32.xlu1 %v873_v62, %s1336_s8 }
 0x2d1   :  { %v1326_v6 = vpop.eup %1325  ;;  %1011 = vrot.lane.b32.xlu0 %v872_v63, %s1336_s8 }
 0x2d2   :  { %v1328_v7 = vpop.eup %1327  ;;  %v875_v14 = vmul.f32 %v1326_v6, %v1223_v51 }
 0x2d3   :  { %v874_v15 = vmul.f32 %v1328_v7, %v843_v29 }
 0x2d4   :  { %1017 = vrot.lane.b32.xlu1 %v875_v14, %s1336_s8 }
 0x2d5   :  { %1015 = vrot.lane.b32.xlu0 %v874_v15, %s1336_s8 }
 0x2ff   :  { %v598_v49 = vpop.xlane.xlu1 %597 }
 0x300   :  { %v614_v52 = vmax.f32 %v598_v49, 1e-24 }
 0x302   :  { %1329 = vrsqrt.f32 %v614_v52 }
 0x303   :  { %v913_v22 = vpop.permute.xlu1 %912 }
 0x304   :  { %960 = vst.msk [vmem:[%s1951_s4 + $0x8] sm:$0xff] %vm958_vm2, %v913_v22 }
 0x306   :  { %v595_v56 = vpop.xlane.xlu0 %594 }
 0x307   :  { %v613_v30 = vmax.f32 %v595_v56, 1e-24  ;;  %v915_v58 = vpop.permute.xlu1 %914 }
 0x308   :  { %961 = vst.msk [vmem:[%s1951_s4 + $0x10] sm:$0xff] %vm958_vm2, %v915_v58 }
 0x309   :  { %1331 = vrsqrt.f32 %v613_v30 }
 0x30a   :  { %v911_v60 = vpop.permute.xlu0 %910 }
 0x30b   :  { %959 = vst.msk [vmem:[%s1951_s4] sm:$0xff] %vm958_vm2, %v911_v60  ;;  %v917_v11 = vpop.permute.xlu1 %916 }
 0x30c   :  { %v1330_v0 = vpop.eup %1329  ;;  %962 = vst.msk [vmem:[%s1951_s4 + $0x18] sm:$0xff] %vm958_vm2, %v917_v11 }
 0x30d   :  { %v877_v2 = vmul.f32 %v1330_v0, %v1226_v1 }
 0x30e   :  { %v919_v4 = vpop.permute.xlu0 %918 }
 0x30f   :  { %963 = vst.msk [vmem:[%s1951_s4 + $0x20] sm:$0xff] %vm958_vm2, %v919_v4  ;;  %1021 = vrot.lane.b32.xlu1 %v877_v2, %s1336_s8  ;;  %v921_v8 = vpop.permute.xlu1 %920 }
 0x310   :  { %964 = vst.msk [vmem:[%s1951_s4 + $0x28] sm:$0xff] %vm958_vm2, %v921_v8 }
 0x312   :  { %v923_v10 = vpop.permute.xlu0 %922 }
 0x313   :  { %v1332_v12 = vpop.eup %1331  ;;  %965 = vst.msk [vmem:[%s1951_s4 + $0x30] sm:$0xff] %vm958_vm2, %v923_v10  ;;  %v925_v17 = vpop.permute.xlu1 %924 }
 0x314   :  { %966 = vst.msk [vmem:[%s1951_s4 + $0x38] sm:$0xff] %vm958_vm2, %v925_v17  ;;  %v876_v16 = vmul.f32 %v1332_v12, %v853_v38 }
 0x316   :  { %1019 = vrot.lane.b32.xlu0 %v876_v16, %s1336_s8  ;;  %v927_v18 = vpop.permute.xlu0 %926 }
 0x317   :  { %967 = vst.msk [vmem:[%s1951_s4 + $0x40] sm:$0xff] %vm958_vm2, %v927_v18  ;;  %v929_v20 = vpop.permute.xlu1 %928 }
 0x318   :  { %968 = vst.msk [vmem:[%s1951_s4 + $0x48] sm:$0xff] %vm958_vm2, %v929_v20 }
 0x31b   :  { %v933_v24 = vpop.permute.xlu1 %932 }
 0x31c   :  { %970 = vst.msk [vmem:[%s1951_s4 + $0x58] sm:$0xff] %vm958_vm2, %v933_v24 }
 0x31f   :  { %v937_v25 = vpop.permute.xlu1 %936 }
 0x320   :  { %972 = vst.msk [vmem:[%s1951_s4 + $0x68] sm:$0xff] %vm958_vm2, %v937_v25 }
 0x323   :  { %v931_v23 = vpop.permute.xlu0 %930 }
 0x324   :  { %969 = vst.msk [vmem:[%s1951_s4 + $0x50] sm:$0xff] %vm958_vm2, %v931_v23 }
 0x327   :  { %v935_v45 = vpop.permute.xlu0 %934 }
 0x328   :  { %971 = vst.msk [vmem:[%s1951_s4 + $0x60] sm:$0xff] %vm958_vm2, %v935_v45 }
 0x32a   :  { %v941_v19 = vpop.permute.xlu1 %940 }
 0x32b   :  { %974 = vst.msk [vmem:[%s1951_s4 + $0x78] sm:$0xff] %vm958_vm2, %v941_v19  ;;  %v939_v31 = vpop.permute.xlu0 %938 }
 0x32c   :  { %973 = vst.msk [vmem:[%s1951_s4 + $0x70] sm:$0xff] %vm958_vm2, %v939_v31 }
 0x32e   :  { %v994_v26 = vpop.permute.xlu1 %993 }
 0x32f   :  { %1041 = vst.msk [vmem:[%s1951_s4 + $0x8] sm:$0xff] %vm1039_vm3, %v994_v26  ;;  %v992_v21 = vpop.permute.xlu0 %991 }
 0x330   :  { %1040 = vst.msk [vmem:[%s1951_s4] sm:$0xff] %vm1039_vm3, %v992_v21 }
 0x332   :  { %v998_v34 = vpop.permute.xlu1 %997 }
 0x333   :  { %1043 = vst.msk [vmem:[%s1951_s4 + $0x18] sm:$0xff] %vm1039_vm3, %v998_v34  ;;  %v996_v35 = vpop.permute.xlu0 %995 }
 0x334   :  { %1042 = vst.msk [vmem:[%s1951_s4 + $0x10] sm:$0xff] %vm1039_vm3, %v996_v35 }
 0x336   :  { %v1002_v53 = vpop.permute.xlu1 %1001 }
 0x337   :  { %1045 = vst.msk [vmem:[%s1951_s4 + $0x28] sm:$0xff] %vm1039_vm3, %v1002_v53  ;;  %v1000_v27 = vpop.permute.xlu0 %999 }
 0x338   :  { %1044 = vst.msk [vmem:[%s1951_s4 + $0x20] sm:$0xff] %vm1039_vm3, %v1000_v27 }
 0x33a   :  { %v1006_v51 = vpop.permute.xlu1 %1005 }
 0x33b   :  { %1047 = vst.msk [vmem:[%s1951_s4 + $0x38] sm:$0xff] %vm1039_vm3, %v1006_v51  ;;  %v1004_v28 = vpop.permute.xlu0 %1003 }
 0x33c   :  { %1046 = vst.msk [vmem:[%s1951_s4 + $0x30] sm:$0xff] %vm1039_vm3, %v1004_v28 }
 0x33e   :  { %v1010_v29 = vpop.permute.xlu1 %1009 }
 0x33f   :  { %1049 = vst.msk [vmem:[%s1951_s4 + $0x48] sm:$0xff] %vm1039_vm3, %v1010_v29  ;;  %v1008_v32 = vpop.permute.xlu0 %1007 }
 0x340   :  { %1048 = vst.msk [vmem:[%s1951_s4 + $0x40] sm:$0xff] %vm1039_vm3, %v1008_v32 }
 0x342   :  { %v1014_v57 = vpop.permute.xlu1 %1013 }
 0x343   :  { %1051 = vst.msk [vmem:[%s1951_s4 + $0x58] sm:$0xff] %vm1039_vm3, %v1014_v57  ;;  %v1012_v33 = vpop.permute.xlu0 %1011 }
 0x344   :  { %1050 = vst.msk [vmem:[%s1951_s4 + $0x50] sm:$0xff] %vm1039_vm3, %v1012_v33 }
 0x346   :  { %v1018_v36 = vpop.permute.xlu1 %1017 }
 0x347   :  { %1053 = vst.msk [vmem:[%s1951_s4 + $0x68] sm:$0xff] %vm1039_vm3, %v1018_v36  ;;  %v1016_v59 = vpop.permute.xlu0 %1015 }
 0x348   :  { %1052 = vst.msk [vmem:[%s1951_s4 + $0x60] sm:$0xff] %vm1039_vm3, %v1016_v59 }
 0x381   :  { %v1022_v61 = vpop.permute.xlu1 %1021 }
 0x382   :  { %1055 = vst.msk [vmem:[%s1951_s4 + $0x78] sm:$0xff] %vm1039_vm3, %v1022_v61 }
 0x388   :  { %v1020_v37 = vpop.permute.xlu0 %1019 }
 0x389   :  { %1054 = vst.msk [vmem:[%s1951_s4 + $0x70] sm:$0xff] %vm1039_vm3, %v1020_v37 }

</bundles_post_ra>
